<compile_context>
chip_gen: v6e
topology: v6e:2x2x1
jax: 0.10.0
libtpu: 0.0.40
codegen_flags: <defaults>
</compile_context>

<pallas_src>
import jax
import jax.numpy as jnp
from jax.experimental import pallas as pl
from jax.experimental.pallas import tpu as pltpu


# ---------------------------------------------------------------------------
# Kernel 1: dense affine  Y = X @ W + b
# Used for both the hoisted input projection and the FC head.
# ---------------------------------------------------------------------------
def dense_kernel(x_ref, w_ref, b_ref, y_ref):
    y_ref[...] = (
        jnp.dot(x_ref[...], w_ref[...], preferred_element_type=jnp.float32)
        + b_ref[...]
    ).astype(y_ref.dtype)


def _pick_row_tile(m, max_tile=256):
    """Largest valid row tile: full M if small, else a mult-of-8 divisor."""
    if m <= max_tile:
        return m
    for t in range(max_tile, 7, -1):
        if m % t == 0 and t % 8 == 0:
            return t
    return m  # fall back to a single full block


def dense(x2d, w_t, b_row):
    """x2d: (M, K), w_t: (K, N), b_row: (1, N)  ->  (M, N) float32."""
    M, K = x2d.shape
    N = w_t.shape[1]
    tm = _pick_row_tile(M)
    return pl.pallas_call(
        dense_kernel,
        out_shape=jax.ShapeDtypeStruct((M, N), jnp.float32),
        grid_spec=pltpu.PrefetchScalarGridSpec(
            num_scalar_prefetch=0,
            grid=(M // tm,),
            in_specs=[
                pl.BlockSpec((tm, K), lambda i: (i, 0)),   # X row tile
                pl.BlockSpec((K, N), lambda i: (0, 0)),    # W (resident)
                pl.BlockSpec((1, N), lambda i: (0, 0)),    # bias row
            ],
            out_specs=pl.BlockSpec((tm, N), lambda i: (i, 0)),
        ),
        compiler_params=pltpu.CompilerParams(
            dimension_semantics=("parallel",),             # rows independent
        ),
    )(x2d, w_t, b_row)


# ---------------------------------------------------------------------------
# Kernel 2: serial recurrence over time chunks.
#   h_t = tanh(xw_t + h_{t-1} @ W_hh^T)     (xw_t already holds x@W_ih^T + b)
# Hidden state lives in VMEM scratch across grid steps; hidden states of the
# whole chunk are written out once per grid step (lane/sublane-denser stores).
# ---------------------------------------------------------------------------
def rnn_recurrence_kernel(xw_ref, whh_ref, hs_ref, h_scratch):
    @pl.when(pl.program_id(0) == 0)
    def _():
        h_scratch[...] = jnp.zeros_like(h_scratch)

    chunk = xw_ref.shape[0]  # static

    def step(t, h):
        h_new = jnp.tanh(
            xw_ref[t]
            + jnp.dot(h, whh_ref[...], preferred_element_type=jnp.float32)
        )
        hs_ref[t] = h_new.astype(hs_ref.dtype)
        return h_new

    h_scratch[...] = jax.lax.fori_loop(
        0, chunk, step, h_scratch[...], unroll=True
    )


def _pick_time_chunk(s, max_chunk=32):
    best = 1
    for c in range(1, min(s, max_chunk) + 1):
        if s % c == 0:
            best = c
    return best


# ---------------------------------------------------------------------------
# Forward pass (matches torch: output, hidden = rnn(x); output = fc(output))
# ---------------------------------------------------------------------------
def rnn_forward(x, w_ih, w_hh, b_ih, b_hh, w_fc, b_fc):
    """x: (S, B, I) float32.  Returns (S, B, O) float32."""
    S, B, I = x.shape
    H = w_ih.shape[0]
    O = w_fc.shape[0]

    # Pre-transpose weights; fold both RNN biases into the input projection.
    wih_t = w_ih.T                        # (I, H)
    whh_t = w_hh.T                        # (H, H)
    wfc_t = w_fc.T                        # (H, O)
    b = (b_ih + b_hh).reshape(1, H)       # (1, H)
    bfc = b_fc.reshape(1, O)              # (1, O)

    # 1) Hoisted input projection as one big "parallel" matmul.
    xw = dense(x.reshape(S * B, I), wih_t, b).reshape(S, B, H)

    # 2) Serial recurrence, chunked over time.
    chunk = _pick_time_chunk(S)
    hs = pl.pallas_call(
        rnn_recurrence_kernel,
        out_shape=jax.ShapeDtypeStruct((S, B, H), jnp.float32),
        grid_spec=pltpu.PrefetchScalarGridSpec(
            num_scalar_prefetch=0,
            grid=(S // chunk,),
            in_specs=[
                pl.BlockSpec((chunk, B, H), lambda c: (c, 0, 0)),  # xw chunk
                pl.BlockSpec((H, H), lambda c: (0, 0)),            # W_hh^T resident
            ],
            out_specs=pl.BlockSpec((chunk, B, H), lambda c: (c, 0, 0)),
            scratch_shapes=[pltpu.VMEM((B, H), jnp.float32)],      # carried h
        ),
        compiler_params=pltpu.CompilerParams(
            dimension_semantics=("arbitrary",),   # time recurrence is serial
        ),
    )(xw, whh_t)

    # 3) FC head as one big "parallel" matmul (out of the serial loop).
    y = dense(hs.reshape(S * B, H), wfc_t, bfc).reshape(S, B, O)
    return y


def rnn_reference(x, w_ih, w_hh, b_ih, b_hh, w_fc, b_fc):
    """Pure-JAX reference mirroring torch.nn.RNN (tanh) + Linear."""
    S, B, I = x.shape
    H = w_ih.shape[0]

    def step(h, x_t):
        h_new = jnp.tanh(x_t @ w_ih.T + b_ih + h @ w_hh.T + b_hh)
        return h_new, h_new

    h0 = jnp.zeros((B, H), jnp.float32)
    _, hs = jax.lax.scan(step, h0, x)          # (S, B, H)
    return hs @ w_fc.T + b_fc                  # (S, B, O)


if __name__ == "__main__":
    # Small shapes consistent with the module.
    S, B, I, H, O = 8, 4, 16, 32, 8

    key = jax.random.PRNGKey(0)
    ks = jax.random.split(key, 7)
    bound = 1.0 / jnp.sqrt(H)

    x = jax.random.normal(ks[0], (S, B, I), jnp.float32)
    w_ih = jax.random.uniform(ks[1], (H, I), jnp.float32, -bound, bound)
    w_hh = jax.random.uniform(ks[2], (H, H), jnp.float32, -bound, bound)
    b_ih = jax.random.uniform(ks[3], (H,), jnp.float32, -bound, bound)
    b_hh = jax.random.uniform(ks[4], (H,), jnp.float32, -bound, bound)
    w_fc = jax.random.uniform(ks[5], (O, H), jnp.float32, -bound, bound)
    b_fc = jax.random.uniform(ks[6], (O,), jnp.float32, -bound, bound)

    out = rnn_forward(x, w_ih, w_hh, b_ih, b_hh, w_fc, b_fc)
    out = jax.block_until_ready(out)

    ref = rnn_reference(x, w_ih, w_hh, b_ih, b_hh, w_fc, b_fc)
    assert out.shape == (S, B, O)
    assert jnp.allclose(out, ref, atol=1e-4, rtol=1e-4), "mismatch vs reference"

    print("KERNEL_OK")
</pallas_src>

<mosaic_0001>
module attributes {stable_mosaic.version = 11 : i64} {
  func.func @dense_kernel(%arg0: i32, %arg1: memref<32x16xf32, #tpu.memory_space<vmem>>, %arg2: memref<16x32xf32, #tpu.memory_space<vmem>>, %arg3: memref<1x32xf32, #tpu.memory_space<vmem>>, %arg4: memref<32x32xf32, #tpu.memory_space<vmem>>) attributes {dimension_semantics = [#tpu.dimension_semantics<parallel>], iteration_bounds = array<i64: 1>, scalar_prefetch = 0 : i64, scratch_operands = 0 : i64, tpu.core_type = #tpu.core_type<tc>, window_params = [{transform_indices = @transform_0, window_bounds = array<i64: 32, 16>}, {pipeline_mode = #tpu.pipeline_mode<synchronous>, transform_indices = @transform_1, window_bounds = array<i64: 16, 32>}, {pipeline_mode = #tpu.pipeline_mode<synchronous>, transform_indices = @transform_2, window_bounds = array<i64: 1, 32>}, {transform_indices = @transform_3, window_bounds = array<i64: 32, 32>}]} {
    %c0 = arith.constant 0 : index
    %c0_0 = arith.constant 0 : index
    %0 = vector.load %arg1[%c0, %c0_0] : memref<32x16xf32, #tpu.memory_space<vmem>>, vector<32x16xf32>
    %c0_1 = arith.constant 0 : index
    %c0_2 = arith.constant 0 : index
    %1 = vector.load %arg2[%c0_1, %c0_2] : memref<16x32xf32, #tpu.memory_space<vmem>>, vector<16x32xf32>
    %cst = arith.constant dense<0.000000e+00> : vector<32x32xf32>
    %2 = tpu.matmul %0, %1, %cst {dimension_numbers = #tpu.dot_dimension_numbers<[1], [0], [0], [1], [0, 0, 1, 1], [], []>} : vector<32x16xf32>, vector<16x32xf32>, vector<32x32xf32> -> vector<32x32xf32>
    %c0_3 = arith.constant 0 : index
    %c0_4 = arith.constant 0 : index
    %3 = vector.load %arg3[%c0_3, %c0_4] : memref<1x32xf32, #tpu.memory_space<vmem>>, vector<1x32xf32>
    %4 = vector.broadcast %3 : vector<1x32xf32> to vector<32x32xf32>
    %5 = arith.addf %2, %4 : vector<32x32xf32>
    %c0_5 = arith.constant 0 : index
    %c0_6 = arith.constant 0 : index
    %6 = vector.load %arg4[%c0_5, %c0_6] : memref<32x32xf32, #tpu.memory_space<vmem>>, vector<32x32xf32>
    tpu.vector_store %arg4[%c0_5, %c0_6], %5 {strides = array<i32>} : memref<32x32xf32, #tpu.memory_space<vmem>>, vector<32x32xf32>,
    return
  }
  func.func @transform_0(%arg0: i32) -> (i32, i32) {
    %c0_i32 = arith.constant 0 : i32
    %c0_i32_0 = arith.constant 0 : i32
    return %arg0, %c0_i32 : i32, i32
  }
  func.func @transform_1(%arg0: i32) -> (i32, i32) {
    %c0_i32 = arith.constant 0 : i32
    %c0_i32_0 = arith.constant 0 : i32
    %c0_i32_1 = arith.constant 0 : i32
    return %c0_i32, %c0_i32_0 : i32, i32
  }
  func.func @transform_2(%arg0: i32) -> (i32, i32) {
    %c0_i32 = arith.constant 0 : i32
    %c0_i32_0 = arith.constant 0 : i32
    %c0_i32_1 = arith.constant 0 : i32
    return %c0_i32, %c0_i32_0 : i32, i32
  }
  func.func @transform_3(%arg0: i32) -> (i32, i32) {
    %c0_i32 = arith.constant 0 : i32
    %c0_i32_0 = arith.constant 0 : i32
    return %arg0, %c0_i32 : i32, i32
  }
}

</mosaic_0001>

<bundles_post_ra>
// kernel: tpu_custom_call.1
= control target key start
LH: loop header
LB: loop body
LE: loop exit
PB: predicated region body
PF: predicated region fallthrough
CT: control target
= control target key end

     0   :  { %vm28_vm0 = vcmask 130048   ;;  %s244_s0 = inlined_call_operand.vmem [shape: f32[32,16], index: 0, kind: input, shape index: {}]   ;;  %s245_s1 = inlined_call_operand.vmem [shape: f32[16,32], index: 1, kind: input, shape index: {}]   ;;  %s246_s2 = inlined_call_operand.vmem [shape: f32[1,32], index: 2, kind: input, shape index: {}]   ;;  %s247_s3 = inlined_call_operand.hbm [shape: f32[32,32], index: 3, kind: output, shape index: {}]  }
   0x1   :  { %v20_v0 = vld [vmem:[%s245_s1 + $0x8] sm:$0xff]  ;;  %v19_v1 = vld [vmem:[%s245_s1] sm:$0xff]  ;;  %v17_v3 = vld [vmem:[%s244_s0 + $0x10] sm:$0xff] }
   0x2   :  { %158 = vmatprep.subr.mxu0 %v20_v0  ;;  %168 = vmatprep.subr.mxu1 %v20_v0  ;;  %v15_v2 = vld [vmem:[%s244_s0] sm:$0xff] }
   0x3   :  { %159 = vmatpush3.msra.mxu0 %v20_v0  ;;  %170 = vmatpush3.msra.mxu1 %v20_v0 }
   0x4   :  { %8 = vsyncpa [#allocation3], 0  ;;  %160 = vmatprep.subr.mxu0 %v19_v1  ;;  %169 = vmatprep.subr.mxu1 %v19_v1  ;;  %v16_v4 = vld [vmem:[%s244_s0 + $0x8] sm:$0xff]  ;;  %v18_v5 = vld [vmem:[%s244_s0 + $0x18] sm:$0xff]  ;;  %s197_s25 = smov [#allocation2]   ;;  %vm126_vm1 = vcmask 261120  }
   0x5   :  { %161 = vmatpush3.msra.mxu0 %v19_v1  ;;  %171 = vmatpush3.msra.mxu1 %v19_v1  ;;  %v147_v6 = vld [vmem:[%s246_s2] ss:$0 sm:$0xff]  ;;  %s136_s26 = sshll.u32 %s197_s25, 4  ;;  %s137_s26 = int_to_ptr.vmem [resolvable:$true] %s136_s26 }
   0x6   :  { %162 = vmatprep.mubr.msk.f32.mxu0 %vm28_vm0, %v15_v2  ;;  %165 = vmatprep.mubr.msk.f32.mxu1 %vm28_vm0, %v17_v3  ;;  %s175_s0 = scalar_lea.vmem %s137_s26, 512  ;;  %p180_p1 = scmp.lt.s32.totalorder %s137_s26, %s137_s26 }
   0x7   :  { %163 = vmatmul.mubr.msk.f32.vlgmr.msra.gmra.mxu0 %vm28_vm0, %v16_v4  ;;  %166 = vmatmul.mubr.msk.f32.vlgmr.msra.gmra.mxu1 %vm28_vm0, %v18_v5  ;;  %p176_p0 = scmp.ne.s32.totalorder %s137_s26, %s175_s0  ;;  %p181_p2 = scmp.lt.s32.totalorder %s175_s0, %s175_s0 }
   0x9   :  { %p182_p3 = por %p181_p2, %p180_p1 }
   0xb   :  { %p183_p4 = pnand %p182_p3, %p176_p0 }
  0xc7   :  { %v164_v7 = vpop.f32.mrf.mxu0  ;;  %v167_v8 = vpop.f32.mrf.mxu1 }
  0xc8   :  { %v113_v9 = vadd.f32 %v164_v7, %v147_v6  ;;  %v123_v10 = vadd.f32 %v167_v8, %v147_v6 }
  0xc9   :  { %v107_v11 = vpop.f32.mrf.mxu0  ;;  %v117_v12 = vpop.f32.mrf.mxu1 }
  0xca   :  { %128 = vst.msk [vmem:[#allocation2 + $0x8] sm:$0xff] %vm126_vm1, %v113_v9  ;;  %130 = vst.msk [vmem:[#allocation2 + $0x18] sm:$0xff] %vm126_vm1, %v123_v10  ;;  %v108_v13 = vadd.f32 %v147_v6, %v107_v11  ;;  %v118_v14 = vadd.f32 %v147_v6, %v117_v12 }
  0xcc   :  { %127 = vst.msk [vmem:[#allocation2] sm:$0xff] %vm126_vm1, %v108_v13  ;;  %129 = vst.msk [vmem:[#allocation2 + $0x10] sm:$0xff] %vm126_vm1, %v118_v14 }
  0xcd   :  { %186 = shalt.err (!%p183_p4)
}
  0xce   :  { %s198_s2 = smov 128   ;;  %s199_s27 = smov 8  }
  0xcf   :  { %142 = dma.vmem_to_hbm [thread:$0]  %s137_s26, 512, %s247_s3, [#allocation3], %s198_s2, %s198_s2, %s199_s27  }
  0xd0   :  { %195 = dma.done.wait [#allocation3], 512  }
  0xd1   :  { %196 = vsyncadd [#allocation3], 4294966784 }
  0xd2   :  { %146 = vsyncpa [#allocation3], 1 }

</bundles_post_ra>
